<compile_context>
chip_gen: v7x
topology: tpu7x:2x2x1
jax: 0.10.0
libtpu: 0.0.40
codegen_flags: <defaults>
</compile_context>

<pallas_src>
import jax
import jax.numpy as jnp
from jax.experimental import pallas as pl
from jax.experimental.pallas import tpu as pltpu


def _round_up(x, m):
    return (x + m - 1) // m * m


def qnet_kernel(x_ref, w1_ref, b1_ref, w2_ref, b2_ref, wh_ref, bh_ref, o_ref):
    # Shared MLP: two Linear+ReLU layers, then all keyword heads as one fused matmul.
    h1 = jnp.dot(x_ref[...], w1_ref[...], preferred_element_type=jnp.float32)
    h1 = jnp.maximum(h1 + b1_ref[...], 0.0)
    h2 = jnp.dot(h1, w2_ref[...], preferred_element_type=jnp.float32)
    h2 = jnp.maximum(h2 + b2_ref[...], 0.0)
    q = jnp.dot(h2, wh_ref[...], preferred_element_type=jnp.float32) + bh_ref[...]
    o_ref[...] = q.astype(o_ref.dtype)


def multi_stock_qvalue_net(x, params, num_keywords, num_actions, tm=128):
    """x: (B, input_dim) float32 -> (B, num_keywords, num_actions) float32."""
    w1, b1, w2, b2, wh, bh = params
    B, input_dim = x.shape
    hidden = w1.shape[1]
    ka = num_keywords * num_actions

    # Lane-pad the fused head output so stores are unmasked (multiple of 128 lanes).
    ka_pad = _round_up(ka, 128)
    if ka_pad != ka:
        wh = jnp.pad(wh, ((0, 0), (0, ka_pad - ka)))
        bh = jnp.pad(bh, ((0, 0), (0, ka_pad - ka)))

    # Batch tile: sublane-aligned, capped at 128 rows (keeps h1/h2 activations
    # at <= 16 vregs each -> no spills, plenty of room for the MXU result pop).
    tm = min(tm, _round_up(max(B, 1), 8))
    bp = _round_up(B, tm)
    if bp != B:
        x = jnp.pad(x, ((0, bp - B), (0, 0)))

    grid = (bp // tm,)

    flops = 2 * bp * (input_dim * hidden + hidden * hidden + hidden * ka_pad)
    bytes_accessed = 4 * (
        bp * input_dim                      # x in
        + input_dim * hidden + hidden       # w1, b1
        + hidden * hidden + hidden          # w2, b2
        + hidden * ka_pad + ka_pad          # wh, bh
        + bp * ka_pad                       # out
    )

    out_flat = pl.pallas_call(
        qnet_kernel,
        out_shape=jax.ShapeDtypeStruct((bp, ka_pad), jnp.float32),
        grid_spec=pl.GridSpec(
            grid=grid,
            in_specs=[
                # x tile moves with the batch grid; weights/biases are resident
                # (same block every step -> DMA'd into VMEM once).
                pl.BlockSpec((tm, input_dim), lambda i: (i, 0)),
                pl.BlockSpec(w1.shape, lambda i: (0, 0)),
                pl.BlockSpec(b1.shape, lambda i: (0, 0)),
                pl.BlockSpec(w2.shape, lambda i: (0, 0)),
                pl.BlockSpec(b2.shape, lambda i: (0, 0)),
                pl.BlockSpec((hidden, ka_pad), lambda i: (0, 0)),
                pl.BlockSpec((1, ka_pad), lambda i: (0, 0)),
            ],
            out_specs=pl.BlockSpec((tm, ka_pad), lambda i: (i, 0)),
        ),
        compiler_params=pltpu.CompilerParams(
            dimension_semantics=("parallel",),
        ),
        cost_estimate=pl.CostEstimate(
            flops=flops, transcendentals=0, bytes_accessed=bytes_accessed),
    )(x, w1, b1, w2, b2, wh, bh)

    # Strip batch + lane padding; torch.stack(q_values, dim=1): head k, action a -> out[:, k, a]
    return out_flat[:B, :ka].reshape(B, num_keywords, num_actions)


def init_params(key, input_dim, hidden, num_keywords, num_actions):
    """Deterministic synthetic parameters (PyTorch Linear weight shapes, pre-transposed)."""
    ks = jax.random.split(key, 6)
    # Linear(input_dim, 128): torch weight (128, input_dim) -> stored as (input_dim, 128)
    w1 = jax.random.normal(ks[0], (input_dim, hidden), jnp.float32) * 0.05
    b1 = jax.random.normal(ks[1], (1, hidden), jnp.float32) * 0.05
    # Linear(128, 128)
    w2 = jax.random.normal(ks[2], (hidden, hidden), jnp.float32) * 0.05
    b2 = jax.random.normal(ks[3], (1, hidden), jnp.float32) * 0.05
    # num_keywords heads Linear(128, num_actions), concatenated along output dim
    wh = jax.random.normal(ks[4], (hidden, num_keywords * num_actions), jnp.float32) * 0.05
    bh = jax.random.normal(ks[5], (1, num_keywords * num_actions), jnp.float32) * 0.05
    return w1, b1, w2, b2, wh, bh


def reference_forward(x, params, num_keywords, num_actions):
    w1, b1, w2, b2, wh, bh = params
    h = jnp.maximum(x @ w1 + b1, 0.0)
    h = jnp.maximum(h @ w2 + b2, 0.0)
    q = h @ wh + bh
    return q.reshape(x.shape[0], num_keywords, num_actions)


if __name__ == "__main__":
    input_dim = 20      # matches module-level input_dim in the reference script
    hidden = 128
    num_keywords = 8    # consistent with env.num_keywords
    num_actions = 3     # matches module-level num_actions

    key = jax.random.PRNGKey(0)
    kx, kp, kx2 = jax.random.split(key, 3)
    params = init_params(kp, input_dim, hidden, num_keywords, num_actions)

    # Small case (batch=2): exercises sublane padding (2 -> 8), single grid step.
    batch = 2
    x = jax.random.normal(kx, (batch, input_dim), jnp.float32)
    q = multi_stock_qvalue_net(x, params, num_keywords, num_actions)
    q = jax.block_until_ready(q)
    q_ref = reference_forward(x, params, num_keywords, num_actions)
    assert q.shape == (batch, num_keywords, num_actions)
    assert jnp.allclose(q, q_ref, atol=1e-4, rtol=1e-4)

    # Larger case: exercises the batch-tiled grid (>1 step) + pipelining path.
    batch2 = 300
    x2 = jax.random.normal(kx2, (batch2, input_dim), jnp.float32)
    q2 = multi_stock_qvalue_net(x2, params, num_keywords, num_actions)
    q2 = jax.block_until_ready(q2)
    q2_ref = reference_forward(x2, params, num_keywords, num_actions)
    assert q2.shape == (batch2, num_keywords, num_actions)
    assert jnp.allclose(q2, q2_ref, atol=1e-4, rtol=1e-4)

    print("KERNEL_OK")
</pallas_src>

<mosaic_0001>
module attributes {stable_mosaic.version = 11 : i64} {
  func.func @qnet_kernel(%arg0: i32, %arg1: memref<8x20xf32, #tpu.memory_space<vmem>>, %arg2: memref<20x128xf32, #tpu.memory_space<vmem>>, %arg3: memref<1x128xf32, #tpu.memory_space<vmem>>, %arg4: memref<128x128xf32, #tpu.memory_space<vmem>>, %arg5: memref<1x128xf32, #tpu.memory_space<vmem>>, %arg6: memref<128x128xf32, #tpu.memory_space<vmem>>, %arg7: memref<1x128xf32, #tpu.memory_space<vmem>>, %arg8: memref<8x128xf32, #tpu.memory_space<vmem>>) attributes {dimension_semantics = [#tpu.dimension_semantics<parallel>], iteration_bounds = array<i64: 1>, scalar_prefetch = 0 : i64, scratch_operands = 0 : i64, tpu.core_type = #tpu.core_type<tc>, window_params = [{transform_indices = @transform_0, window_bounds = array<i64: 8, 20>}, {pipeline_mode = #tpu.pipeline_mode<synchronous>, transform_indices = @transform_1, window_bounds = array<i64: 20, 128>}, {pipeline_mode = #tpu.pipeline_mode<synchronous>, transform_indices = @transform_2, window_bounds = array<i64: 1, 128>}, {pipeline_mode = #tpu.pipeline_mode<synchronous>, transform_indices = @transform_3, window_bounds = array<i64: 128, 128>}, {pipeline_mode = #tpu.pipeline_mode<synchronous>, transform_indices = @transform_4, window_bounds = array<i64: 1, 128>}, {pipeline_mode = #tpu.pipeline_mode<synchronous>, transform_indices = @transform_5, window_bounds = array<i64: 128, 128>}, {pipeline_mode = #tpu.pipeline_mode<synchronous>, transform_indices = @transform_6, window_bounds = array<i64: 1, 128>}, {transform_indices = @transform_7, window_bounds = array<i64: 8, 128>}]} {
    %c0 = arith.constant 0 : index
    %c0_0 = arith.constant 0 : index
    %0 = vector.load %arg1[%c0, %c0_0] : memref<8x20xf32, #tpu.memory_space<vmem>>, vector<8x20xf32>
    %c0_1 = arith.constant 0 : index
    %c0_2 = arith.constant 0 : index
    %1 = vector.load %arg2[%c0_1, %c0_2] : memref<20x128xf32, #tpu.memory_space<vmem>>, vector<20x128xf32>
    %cst = arith.constant dense<0.000000e+00> : vector<8x128xf32>
    %2 = tpu.matmul %0, %1, %cst {dimension_numbers = #tpu.dot_dimension_numbers<[1], [0], [0], [1], [0, 0, 1, 1], [], []>} : vector<8x20xf32>, vector<20x128xf32>, vector<8x128xf32> -> vector<8x128xf32>
    %c0_3 = arith.constant 0 : index
    %c0_4 = arith.constant 0 : index
    %3 = vector.load %arg3[%c0_3, %c0_4] : memref<1x128xf32, #tpu.memory_space<vmem>>, vector<1x128xf32>
    %4 = vector.broadcast %3 : vector<1x128xf32> to vector<8x128xf32>
    %5 = arith.addf %2, %4 : vector<8x128xf32>
    %cst_5 = arith.constant 0.000000e+00 : f32
    %6 = vector.broadcast %cst_5 : f32 to vector<8x128xf32>
    %7 = arith.maximumf %5, %6 : vector<8x128xf32>
    %c0_6 = arith.constant 0 : index
    %c0_7 = arith.constant 0 : index
    %8 = vector.load %arg4[%c0_6, %c0_7] : memref<128x128xf32, #tpu.memory_space<vmem>>, vector<128x128xf32>
    %cst_8 = arith.constant dense<0.000000e+00> : vector<8x128xf32>
    %9 = tpu.matmul %7, %8, %cst_8 {dimension_numbers = #tpu.dot_dimension_numbers<[1], [0], [0], [1], [0, 0, 1, 1], [], []>} : vector<8x128xf32>, vector<128x128xf32>, vector<8x128xf32> -> vector<8x128xf32>
    %c0_9 = arith.constant 0 : index
    %c0_10 = arith.constant 0 : index
    %10 = vector.load %arg5[%c0_9, %c0_10] : memref<1x128xf32, #tpu.memory_space<vmem>>, vector<1x128xf32>
    %11 = vector.broadcast %10 : vector<1x128xf32> to vector<8x128xf32>
    %12 = arith.addf %9, %11 : vector<8x128xf32>
    %cst_11 = arith.constant 0.000000e+00 : f32
    %13 = vector.broadcast %cst_11 : f32 to vector<8x128xf32>
    %14 = arith.maximumf %12, %13 : vector<8x128xf32>
    %c0_12 = arith.constant 0 : index
    %c0_13 = arith.constant 0 : index
    %15 = vector.load %arg6[%c0_12, %c0_13] : memref<128x128xf32, #tpu.memory_space<vmem>>, vector<128x128xf32>
    %cst_14 = arith.constant dense<0.000000e+00> : vector<8x128xf32>
    %16 = tpu.matmul %14, %15, %cst_14 {dimension_numbers = #tpu.dot_dimension_numbers<[1], [0], [0], [1], [0, 0, 1, 1], [], []>} : vector<8x128xf32>, vector<128x128xf32>, vector<8x128xf32> -> vector<8x128xf32>
    %c0_15 = arith.constant 0 : index
    %c0_16 = arith.constant 0 : index
    %17 = vector.load %arg7[%c0_15, %c0_16] : memref<1x128xf32, #tpu.memory_space<vmem>>, vector<1x128xf32>
    %18 = vector.broadcast %17 : vector<1x128xf32> to vector<8x128xf32>
    %19 = arith.addf %16, %18 : vector<8x128xf32>
    %c0_17 = arith.constant 0 : index
    %c0_18 = arith.constant 0 : index
    %20 = vector.load %arg8[%c0_17, %c0_18] : memref<8x128xf32, #tpu.memory_space<vmem>>, vector<8x128xf32>
    tpu.vector_store %arg8[%c0_17, %c0_18], %19 {strides = array<i32>} : memref<8x128xf32, #tpu.memory_space<vmem>>, vector<8x128xf32>,
    return
  }
  func.func @transform_0(%arg0: i32) -> (i32, i32) {
    %c0_i32 = arith.constant 0 : i32
    %c0_i32_0 = arith.constant 0 : i32
    return %arg0, %c0_i32 : i32, i32
  }
  func.func @transform_1(%arg0: i32) -> (i32, i32) {
    %c0_i32 = arith.constant 0 : i32
    %c0_i32_0 = arith.constant 0 : i32
    %c0_i32_1 = arith.constant 0 : i32
    return %c0_i32, %c0_i32_0 : i32, i32
  }
  func.func @transform_2(%arg0: i32) -> (i32, i32) {
    %c0_i32 = arith.constant 0 : i32
    %c0_i32_0 = arith.constant 0 : i32
    %c0_i32_1 = arith.constant 0 : i32
    return %c0_i32, %c0_i32_0 : i32, i32
  }
  func.func @transform_3(%arg0: i32) -> (i32, i32) {
    %c0_i32 = arith.constant 0 : i32
    %c0_i32_0 = arith.constant 0 : i32
    %c0_i32_1 = arith.constant 0 : i32
    return %c0_i32, %c0_i32_0 : i32, i32
  }
  func.func @transform_4(%arg0: i32) -> (i32, i32) {
    %c0_i32 = arith.constant 0 : i32
    %c0_i32_0 = arith.constant 0 : i32
    %c0_i32_1 = arith.constant 0 : i32
    return %c0_i32, %c0_i32_0 : i32, i32
  }
  func.func @transform_5(%arg0: i32) -> (i32, i32) {
    %c0_i32 = arith.constant 0 : i32
    %c0_i32_0 = arith.constant 0 : i32
    %c0_i32_1 = arith.constant 0 : i32
    return %c0_i32, %c0_i32_0 : i32, i32
  }
  func.func @transform_6(%arg0: i32) -> (i32, i32) {
    %c0_i32 = arith.constant 0 : i32
    %c0_i32_0 = arith.constant 0 : i32
    %c0_i32_1 = arith.constant 0 : i32
    return %c0_i32, %c0_i32_0 : i32, i32
  }
  func.func @transform_7(%arg0: i32) -> (i32, i32) {
    %c0_i32 = arith.constant 0 : i32
    %c0_i32_0 = arith.constant 0 : i32
    return %arg0, %c0_i32 : i32, i32
  }
}

</mosaic_0001>

<bundles_post_ra>
// kernel: tpu_custom_call.1
= control target key start
LH: loop header
LB: loop body
LE: loop exit
PB: predicated region body
PF: predicated region fallthrough
CT: control target
= control target key end

     0   :  { %12 = vsyncpa [#allocation3], 0  ;;  %s824_s0 = inlined_call_operand.hbm [shape: f32[8,20], index: 0, kind: input, shape index: {}]   ;;  %s825_s1 = inlined_call_operand.hbm [shape: f32[20,128], index: 1, kind: input, shape index: {}]   ;;  %s826_s2 = inlined_call_operand.vmem [shape: f32[1,128], index: 2, kind: input, shape index: {}]   ;;  %s827_s3 = inlined_call_operand.hbm [shape: f32[128,128], index: 3, kind: input, shape index: {}]   ;;  %s828_s4 = inlined_call_operand.vmem [shape: f32[1,128], index: 4, kind: input, shape index: {}]   ;;  %s829_s5 = inlined_call_operand.hbm [shape: f32[128,128], index: 5, kind: input, shape index: {}]   ;;  %s830_s6 = inlined_call_operand.vmem [shape: f32[1,128], index: 6, kind: input, shape index: {}]   ;;  %s831_s7 = inlined_call_operand.hbm [shape: f32[8,128], index: 7, kind: output, shape index: {}]  }
   0x1   :  { %13 = vsyncpa [#allocation6], 0 }
   0x2   :  { %14 = vsyncpa [#allocation9], 0 }
   0x3   :  { %15 = vsyncpa [#allocation4], 0  ;;  %s676_s24 = smov [#allocation5]   ;;  %s558_s28 = scalar_lea.hbm %s825_s1, 384 }
   0x4   :  { %s31_s25 = sshll.u32 %s676_s24, 4  ;;  %p559_p0 = scmp.ne.s32.totalorder %s825_s1, %s558_s28  ;;  %s32_s25 = int_to_ptr.vmem [resolvable:$true] %s31_s25 }
   0x5   :  { %p562_p1 = scmp.lt.u32.totalorder %s558_s28, %s825_s1 }
   0x7   :  { %p564_p2 = pnand %p562_p1, %p559_p0 }
   0x9   :  { %567 = shalt.err (!%p564_p2)
}
   0xa   :  { %s568_s10 = scalar_lea.vmem %s32_s25, 384  ;;  %p573_p4 = scmp.lt.s32.totalorder %s32_s25, %s32_s25 }
   0xb   :  { %p569_p3 = scmp.ne.s32.totalorder %s32_s25, %s568_s10  ;;  %p574_p5 = scmp.lt.s32.totalorder %s568_s10, %s568_s10 }
   0xd   :  { %p575_p6 = por %p574_p5, %p573_p4 }
   0xf   :  { %p576_p7 = pnand %p575_p6, %p569_p3 }
  0x11   :  { %579 = shalt.err (!%p576_p7)
}
  0x12   :  { %s677_s11 = smov 128   ;;  %s678_s12 = smov 8  }
  0x13   :  { %37 = dma.hbm_to_vmem [thread:$0]  %s825_s1, 384, %s32_s25, [#allocation6], %s677_s11, %s677_s11, %s678_s12  }
  0x14   :  { %s679_s15 = smov [#allocation2]   ;;  %s680_s17 = smov [#allocation7]  }
  0x15   :  { %s22_s16 = sshll.u32 %s679_s15, 4  ;;  %s45_s18 = sshll.u32 %s680_s17, 4  ;;  %s23_s16 = int_to_ptr.vmem [resolvable:$true] %s22_s16  ;;  %s46_s18 = int_to_ptr.vmem [resolvable:$true] %s45_s18 }
  0x16   :  { %s580_s21 = scalar_lea.hbm %s824_s0, 128 }
  0x17   :  { %p581_p8 = scmp.ne.s32.totalorder %s824_s0, %s580_s21  ;;  %p584_p9 = scmp.lt.u32.totalorder %s580_s21, %s824_s0 }
  0x19   :  { %p586_p10 = pnand %p584_p9, %p581_p8 }
  0x1b   :  { %589 = shalt.err (!%p586_p10)
}
  0x1c   :  { %s590_s1 = scalar_lea.vmem %s23_s16, 128  ;;  %p595_p12 = scmp.lt.s32.totalorder %s23_s16, %s23_s16 }
  0x1d   :  { %p591_p11 = scmp.ne.s32.totalorder %s23_s16, %s590_s1  ;;  %p596_p13 = scmp.lt.s32.totalorder %s590_s1, %s590_s1 }
  0x1f   :  { %p597_p0 = por %p596_p13, %p595_p12 }
  0x21   :  { %p598_p1 = pnand %p597_p0, %p591_p11 }
  0x23   :  { %601 = shalt.err (!%p598_p1)
}
  0x24   :  { %25 = dma.hbm_to_vmem [thread:$0]  %s824_s0, 128, %s23_s16, [#allocation3]  }
  0x25   :  { %s602_s30 = scalar_lea.hbm %s827_s3, 2048 }
  0x26   :  { %p603_p2 = scmp.ne.s32.totalorder %s827_s3, %s602_s30  ;;  %p606_p3 = scmp.lt.u32.totalorder %s602_s30, %s827_s3 }
  0x28   :  { %p608_p4 = pnand %p606_p3, %p603_p2 }
  0x2a   :  { %611 = shalt.err (!%p608_p4)
}
  0x2b   :  { %s612_s14 = scalar_lea.vmem %s46_s18, 2048  ;;  %p617_p6 = scmp.lt.s32.totalorder %s46_s18, %s46_s18 }
  0x2c   :  { %p613_p5 = scmp.ne.s32.totalorder %s46_s18, %s612_s14  ;;  %p618_p7 = scmp.lt.s32.totalorder %s612_s14, %s612_s14 }
  0x2e   :  { %p619_p8 = por %p618_p7, %p617_p6 }
  0x30   :  { %p620_p9 = pnand %p619_p8, %p613_p5 }
  0x32   :  { %623 = shalt.err (!%p620_p9)
}
  0x33   :  { %51 = dma.hbm_to_vmem [thread:$0]  %s827_s3, 2048, %s46_s18, [#allocation6], %s677_s11, %s677_s11, %s678_s12  }
  0x34   :  { %s681_s16 = smov [#allocation8]   ;;  %s624_s21 = scalar_lea.hbm %s829_s5, 2048 }
  0x35   :  { %s59_s17 = sshll.u32 %s681_s16, 4  ;;  %p625_p10 = scmp.ne.s32.totalorder %s829_s5, %s624_s21  ;;  %s60_s17 = int_to_ptr.vmem [resolvable:$true] %s59_s17 }
  0x36   :  { %p628_p11 = scmp.lt.u32.totalorder %s624_s21, %s829_s5 }
  0x38   :  { %p630_p12 = pnand %p628_p11, %p625_p10 }
  0x3a   :  { %633 = shalt.err (!%p630_p12)
}
  0x3b   :  { %s634_s1 = scalar_lea.vmem %s60_s17, 2048  ;;  %p639_p0 = scmp.lt.s32.totalorder %s60_s17, %s60_s17 }
  0x3c   :  { %p635_p13 = scmp.ne.s32.totalorder %s60_s17, %s634_s1  ;;  %p640_p1 = scmp.lt.s32.totalorder %s634_s1, %s634_s1 }
  0x3e   :  { %p641_p2 = por %p640_p1, %p639_p0 }
  0x40   :  { %p642_p3 = pnand %p641_p2, %p635_p13 }
  0x42   :  { %645 = shalt.err (!%p642_p3)
}
  0x43   :  { %65 = dma.hbm_to_vmem [thread:$0]  %s829_s5, 2048, %s60_s17, [#allocation9], %s677_s11, %s677_s11, %s678_s12  }
  0x44   :  { %668 = dma.done.wait [#allocation3], 128  }
  0x45   :  { %669 = vsyncadd [#allocation3], 4294967168 }
  0x46   :  { %670 = dma.done.wait [#allocation6], 2432  }
  0x47   :  { %671 = vsyncadd [#allocation6], 4294964864 }
  0x48   :  { %672 = dma.done.wait [#allocation9], 2048  }
  0x49   :  { %673 = vsyncadd [#allocation9], 4294965248  ;;  %v682_v0 = vmov 0.0|0.0   ;;  %vm683_vm0 = vmmov 0   ;;  %v684_v1 = vmov 0.0   ;;  %v81_v2 = vld [vmem:[#allocation5] sm:$0xff] }
  0x4a   :  { %497 = vmatprep.subr.bf16.mxu0 %v682_v0  ;;  %424 = vmatprep.mubr.msk.f32.mxu0 %vm683_vm0, %v684_v1  ;;  %v82_v3 = vld [vmem:[#allocation5 + $0x8] sm:$0xff]  ;;  %v170_v5 = vld [vmem:[#allocation7] sm:$0xff]  ;;  %v171_v6 = vld [vmem:[#allocation7 + $0x8] sm:$0xff]  ;;  %vm95_vm1 = vcmask 1043456   ;;  %vm91_vm2 = vcmask 162816   ;;  %s685_s28 = smov [#allocation10]  }
  0x4b   :  { %500 = vmatprep.subr.bf16.mxu1 %v682_v0  ;;  %459 = vmatprep.mubr.msk.f32.mxu1 %vm683_vm0, %v684_v1  ;;  %v498_v4 = vpack.c.bf16 %v82_v3, %v81_v2  ;;  %v501_v7 = vpack.c.bf16 %v171_v6, %v170_v5  ;;  %v172_v8 = vld [vmem:[#allocation7 + $0x10] sm:$0xff]  ;;  %v173_v9 = vld [vmem:[#allocation7 + $0x18] sm:$0xff]  ;;  %v80_v12 = vld [vmem:[#allocation2] sm:$0xff]  ;;  %s364_s29 = sshll.u32 %s685_s28, 4  ;;  %s365_s29 = int_to_ptr.vmem [resolvable:$true] %s364_s29 }
  0x4c   :  { %v83_v10 = vld [vmem:[#allocation5 + $0x10] sm:$0xf]  ;;  %v504_v11 = vpack.c.bf16 %v173_v9, %v172_v8  ;;  %v174_v13 = vld [vmem:[#allocation7 + $0x20] sm:$0xff]  ;;  %v175_v14 = vld [vmem:[#allocation7 + $0x28] sm:$0xff]  ;;  %s646_s30 = scalar_lea.vmem %s365_s29, 128  ;;  %p651_p5 = scmp.lt.s32.totalorder %s365_s29, %s365_s29 }
  0x4d   :  { %499 = vmatpush3.bf16.msra.mxu0 %v498_v4  ;;  %502 = vmatpush3.bf16.msra.mxu1 %v501_v7  ;;  %v507_v15 = vpack.c.bf16 %v175_v14, %v174_v13  ;;  %v176_v16 = vld [vmem:[#allocation7 + $0x30] sm:$0xff]  ;;  %v177_v17 = vld [vmem:[#allocation7 + $0x38] sm:$0xff]  ;;  %v178_v19 = vld [vmem:[#allocation7 + $0x40] sm:$0xff]  ;;  %p647_p4 = scmp.ne.s32.totalorder %s365_s29, %s646_s30  ;;  %p652_p6 = scmp.lt.s32.totalorder %s646_s30, %s646_s30 }
  0x4e   :  { %422 = vmatprep.subr.mxu0 %v684_v1  ;;  %503 = vmatprep.subr.bf16.mxu1 %v682_v0  ;;  %v510_v18 = vpack.c.bf16 %v177_v17, %v176_v16  ;;  %v179_v20 = vld [vmem:[#allocation7 + $0x48] sm:$0xff]  ;;  %v180_v22 = vld [vmem:[#allocation7 + $0x50] sm:$0xff]  ;;  %v181_v23 = vld [vmem:[#allocation7 + $0x58] sm:$0xff] }
  0x4f   :  { %v513_v21 = vpack.c.bf16 %v179_v20, %v178_v19  ;;  %v516_v24 = vpack.c.bf16 %v181_v23, %v180_v22  ;;  %v182_v25 = vld [vmem:[#allocation7 + $0x60] sm:$0xff]  ;;  %v183_v26 = vld [vmem:[#allocation7 + $0x68] sm:$0xff]  ;;  %v184_v28 = vld [vmem:[#allocation7 + $0x70] sm:$0xff]  ;;  %p653_p7 = por %p652_p6, %p651_p5 }
  0x50   :  { %v519_v27 = vpack.c.bf16 %v183_v26, %v182_v25  ;;  %v185_v29 = vld [vmem:[#allocation7 + $0x78] sm:$0xff]  ;;  %v264_v31 = vld [vmem:[#allocation8] sm:$0xff]  ;;  %v265_v32 = vld [vmem:[#allocation8 + $0x8] sm:$0xff] }
  0x51   :  { %423 = vmatpush3.msk.msra.mxu0 %vm95_vm1, %v83_v10  ;;  %505 = vmatpush3.bf16.msra.mxu1 %v504_v11  ;;  %v522_v30 = vpack.c.bf16 %v185_v29, %v184_v28  ;;  %v266_v33 = vld [vmem:[#allocation8 + $0x10] sm:$0xff]  ;;  %v525_v34 = vpack.c.bf16 %v265_v32, %v264_v31  ;;  %v267_v35 = vld [vmem:[#allocation8 + $0x18] sm:$0xff]  ;;  %v268_v37 = vld [vmem:[#allocation8 + $0x20] sm:$0xff]  ;;  %p654_p8 = pnand %p653_p7, %p647_p4 }
  0x52   :  { %425 = vmatmul.mubr.msk.f32.vlgmr.msra.gmra.mrb[0].mxu0 %vm91_vm2, %v80_v12  ;;  %506 = vmatprep.subr.bf16.mxu1 %v682_v0  ;;  %v528_v36 = vpack.c.bf16 %v267_v35, %v266_v33  ;;  %v269_v38 = vld [vmem:[#allocation8 + $0x28] sm:$0xff]  ;;  %v270_v40 = vld [vmem:[#allocation8 + $0x30] sm:$0xff]  ;;  %v271_v41 = vld [vmem:[#allocation8 + $0x38] sm:$0xff] }
  0x53   :  { %524 = vmatprep.subr.bf16.mxu0 %v682_v0  ;;  %494 = vmatprep.mubr.msk.f32.mxu0 %vm683_vm0, %v684_v1  ;;  %v531_v39 = vpack.c.bf16 %v269_v38, %v268_v37  ;;  %v534_v42 = vpack.c.bf16 %v271_v41, %v270_v40  ;;  %v272_v43 = vld [vmem:[#allocation8 + $0x40] sm:$0xff]  ;;  %v273_v44 = vld [vmem:[#allocation8 + $0x48] sm:$0xff]  ;;  %v274_v46 = vld [vmem:[#allocation8 + $0x50] sm:$0xff] }
  0x54   :  { %526 = vmatpush3.bf16.msra.mxu0 %v525_v34  ;;  %v537_v45 = vpack.c.bf16 %v273_v44, %v272_v43  ;;  %v275_v47 = vld [vmem:[#allocation8 + $0x58] sm:$0xff]  ;;  %v276_v49 = vld [vmem:[#allocation8 + $0x60] sm:$0xff]  ;;  %v277_v50 = vld [vmem:[#allocation8 + $0x68] sm:$0xff] }
  0x55   :  { %508 = vmatpush3.bf16.msra.mxu1 %v507_v15  ;;  %527 = vmatprep.subr.bf16.mxu0 %v682_v0  ;;  %v540_v48 = vpack.c.bf16 %v275_v47, %v274_v46  ;;  %v543_v51 = vpack.c.bf16 %v277_v50, %v276_v49  ;;  %v375_v52 = vld [vmem:[%s826_s2] ss:$0 sm:$0xff]  ;;  %v278_v57 = vld [vmem:[#allocation8 + $0x70] sm:$0xff]  ;;  %v279_v58 = vld [vmem:[#allocation8 + $0x78] sm:$0xff] }
  0x56   :  { %509 = vmatprep.subr.bf16.mxu1 %v682_v0  ;;  %v546_v59 = vpack.c.bf16 %v279_v58, %v278_v57  ;;  %v378_v60 = vld [vmem:[%s828_s4] ss:$0 sm:$0xff] }
  0x57   :  { %v379_v1 = vld [vmem:[%s830_s6] ss:$0 sm:$0xff] }
  0x58   :  { %529 = vmatpush3.bf16.msra.mxu0 %v528_v36 }
  0x59   :  { %511 = vmatpush3.bf16.msra.mxu1 %v510_v18  ;;  %530 = vmatprep.subr.bf16.mxu0 %v682_v0 }
  0x5a   :  { %512 = vmatprep.subr.bf16.mxu1 %v682_v0 }
  0x5c   :  { %532 = vmatpush3.bf16.msra.mxu0 %v531_v39 }
  0x5d   :  { %514 = vmatpush3.bf16.msra.mxu1 %v513_v21  ;;  %533 = vmatprep.subr.bf16.mxu0 %v682_v0 }
  0x5e   :  { %515 = vmatprep.subr.bf16.mxu1 %v682_v0 }
  0x60   :  { %535 = vmatpush3.bf16.msra.mxu0 %v534_v42 }
  0x61   :  { %517 = vmatpush3.bf16.msra.mxu1 %v516_v24  ;;  %536 = vmatprep.subr.bf16.mxu0 %v682_v0 }
  0x62   :  { %518 = vmatprep.subr.bf16.mxu1 %v682_v0 }
  0x64   :  { %538 = vmatpush3.bf16.msra.mxu0 %v537_v45 }
  0x65   :  { %520 = vmatpush3.bf16.msra.mxu1 %v519_v27  ;;  %539 = vmatprep.subr.bf16.mxu0 %v682_v0 }
  0x66   :  { %521 = vmatprep.subr.bf16.mxu1 %v682_v0 }
  0x68   :  { %541 = vmatpush3.bf16.msra.mxu0 %v540_v48 }
  0x69   :  { %523 = vmatpush3.bf16.msra.mxu1 %v522_v30  ;;  %542 = vmatprep.subr.bf16.mxu0 %v682_v0 }
  0x6c   :  { %544 = vmatpush3.bf16.msra.mxu0 %v543_v51 }
  0x6d   :  { %545 = vmatprep.subr.bf16.mxu0 %v682_v0 }
  0x70   :  { %547 = vmatpush3.bf16.msra.mxu0 %v546_v59 }
 0x125   :  { %v165_v53 = vpop.f32.mrb[0].mxu0 }
 0x126   :  { %v166_v54 = vadd.f32 %v375_v52, %v165_v53  ;;  %v426_v55 = vpop.f32.mrb[1].mxu0 }
 0x128   :  { %v169_v56 = vmax.f32 %v166_v54, 0.0 }
 0x12a   :  { %460 = vmatmul.mubr.f32.vlgmr.msra.gmra.mrb[0].mxu1 %v169_v56 }
 0x1fd   :  { %v259_v61 = vpop.f32.mrb[0].mxu1 }
 0x1fe   :  { %v260_v62 = vadd.f32 %v378_v60, %v259_v61  ;;  %v461_v63 = vpop.f32.mrb[1].mxu1 }
 0x200   :  { %v263_v0 = vmax.f32 %v260_v62, 0.0 }
 0x202   :  { %495 = vmatmul.mubr.f32.vlgmr.msra.gmra.mrb[2].mxu0 %v263_v0 }
 0x2d5   :  { %v353_v2 = vpop.f32.mrb[2].mxu0 }
 0x2d6   :  { %v354_v3 = vadd.f32 %v379_v1, %v353_v2  ;;  %v496_v4 = vpop.f32.mrb[3].mxu0 }
 0x2d8   :  { %357 = vst [vmem:[#allocation10] sm:$0xff] %v354_v3 }
 0x2d9   :  { %657 = shalt.err (!%p654_p8)
}
 0x2da   :  { %s658_s9 = scalar_lea.hbm %s831_s7, 128 }
 0x2db   :  { %p659_p9 = scmp.ne.s32.totalorder %s831_s7, %s658_s9  ;;  %p662_p10 = scmp.lt.u32.totalorder %s658_s9, %s831_s7 }
 0x2dd   :  { %p664_p11 = pnand %p662_p10, %p659_p9 }
 0x2df   :  { %667 = shalt.err (!%p664_p11)
}
 0x2e0   :  { %367 = dma.vmem_to_hbm [thread:$0]  %s365_s29, 128, %s831_s7, [#allocation4]  }
 0x2e1   :  { %674 = dma.done.wait [#allocation4], 128  }
 0x2e2   :  { %675 = vsyncadd [#allocation4], 4294967168 }
 0x2e3   :  { %371 = vsyncpa [#allocation3], 1 }
 0x2e4   :  { %372 = vsyncpa [#allocation6], 1 }
 0x2e5   :  { %373 = vsyncpa [#allocation9], 1 }
 0x2e6   :  { %374 = vsyncpa [#allocation4], 1 }

</bundles_post_ra>
